<compile_context>
chip_gen: v5e
topology: v5e:2x2
jax: 0.10.0
libtpu: 0.0.40
codegen_flags: <defaults>
</compile_context>

<pallas_src>
import functools

import jax
import jax.numpy as jnp
from jax import lax
from jax.experimental import pallas as pl
from jax.experimental.pallas import tpu as pltpu


def _round_up(x, m):
    return ((x + m - 1) // m) * m


def _ds(start, size, stride):
    # Plain slice when stride == 1, strided slice otherwise.
    return pl.ds(start, size) if stride == 1 else pl.ds(start, size, stride)


# ----------------------------------------------------------------------------
# Pallas kernels
# ----------------------------------------------------------------------------
def _conv_matmul_kernel(p_ref, w_ref, b_ref, o_ref):
    # patches (TM, Kp) bf16 @ weight (Kp, Np) bf16 -> f32 on MXU, + bias.
    o_ref[...] = (
        jnp.dot(p_ref[...], w_ref[...], preferred_element_type=jnp.float32)
        + b_ref[...]
    )


def _maxpool3d_kernel(x_ref, o_ref, *, ksize, stride, odims, frame_blocked):
    # x_ref: (kf, Hp, Wp, C) if frame_blocked else (Fp, Hp, Wp, C); -inf padded
    # o_ref: (Ho, Wo, C)  one pooled output frame (lane-dense C)
    kf, kh, kw = ksize
    sf, sh, sw = stride
    _, Ho, Wo = odims
    fo = pl.program_id(1)

    acc = None
    for df in range(kf):
        # Frame selection: static index when the BlockSpec already windowed the
        # frame axis, otherwise a dynamic first-axis index into the full block.
        fr = x_ref.at[df] if frame_blocked else x_ref.at[fo * sf + df]
        for dh in range(kh):
            for dw in range(kw):
                tap = fr[_ds(dh, Ho, sh), _ds(dw, Wo, sw), :]
                acc = tap if acc is None else jnp.maximum(acc, tap)
    o_ref[...] = acc


# ----------------------------------------------------------------------------
# Wrappers
# ----------------------------------------------------------------------------
def _patch_conv(x, w, b, *, tile_m=2048):
    """x: (B, F, H, W, Cin) channels-last; w: (Cout, Cin, fk, kh, kw); b: (Cout,).

    Returns (B, Fo, Ho, Wo, Np) float32 with Np = round_up(Cout, 128);
    channels >= Cout are zero (sliced off later)."""
    B, F, H, W, Cin = x.shape
    Cout, _, fk, kh, kw = w.shape
    Fo, Ho, Wo = F // fk, H // kh, W // kw

    # bf16 before the big patch transpose to halve HBM traffic.
    x = x.astype(jnp.bfloat16)
    x = x[:, : Fo * fk, : Ho * kh, : Wo * kw, :]
    x = x.reshape(B, Fo, fk, Ho, kh, Wo, kw, Cin)
    # -> (B, Fo, Ho, Wo, Cin, fk, kh, kw): matches Conv3d weight flatten order.
    x = x.transpose(0, 1, 3, 5, 7, 2, 4, 6)

    M = B * Fo * Ho * Wo
    K = Cin * fk * kh * kw
    patches = x.reshape(M, K)

    Kp = _round_up(K, 128)                      # lane-dense contraction dim
    Np = _round_up(Cout, 128)                   # lane-dense output dim
    TM = min(tile_m, _round_up(M, 8))           # M tile (VMEM ~1-2 MB/step)
    Mp = _round_up(M, TM)

    patches = jnp.pad(patches, ((0, Mp - M), (0, Kp - K)))
    w_mat = jnp.pad(w.reshape(Cout, K).T.astype(jnp.bfloat16),
                    ((0, Kp - K), (0, Np - Cout)))
    b_mat = jnp.pad(b.astype(jnp.float32).reshape(1, Cout),
                    ((0, 0), (0, Np - Cout)))

    out = pl.pallas_call(
        _conv_matmul_kernel,
        out_shape=jax.ShapeDtypeStruct((Mp, Np), jnp.float32),
        grid=(Mp // TM,),
        in_specs=[
            pl.BlockSpec((TM, Kp), lambda i: (i, 0)),
            pl.BlockSpec((Kp, Np), lambda i: (0, 0)),   # resident weight
            pl.BlockSpec((1, Np), lambda i: (0, 0)),    # resident bias
        ],
        out_specs=pl.BlockSpec((TM, Np), lambda i: (i, 0)),
        compiler_params=pltpu.CompilerParams(
            dimension_semantics=("parallel",)),
    )(patches, w_mat, b_mat)
    return out[:M].reshape(B, Fo, Ho, Wo, Np)


def _maxpool3d(x, ksize, stride, pad):
    """x: (B, F, H, W, C) float32 channels-last (C a multiple of 128)."""
    B, F, H, W, C = x.shape
    kf, kh, kw = ksize
    sf, sh, sw = stride
    pf, ph, pw = pad
    Fo = (F + 2 * pf - kf) // sf + 1
    Ho = (H + 2 * ph - kh) // sh + 1
    Wo = (W + 2 * pw - kw) // sw + 1

    # -inf padding == PyTorch MaxPool3d padding semantics.
    xp = jnp.pad(x, ((0, 0), (pf, pf), (ph, ph), (pw, pw), (0, 0)),
                 constant_values=-jnp.inf)
    Fp, Hp, Wp = F + 2 * pf, H + 2 * ph, W + 2 * pw

    # Non-overlapping frame windows (module default: kernel 1, stride 1, pad 0)
    # can be expressed directly in the BlockSpec -> only kf frames in VMEM per
    # step, no dynamic frame index in the kernel.
    frame_blocked = (pf == 0 and kf == sf)
    fblk = kf if frame_blocked else Fp
    if frame_blocked:
        in_index = lambda b, f: (b, f, 0, 0, 0)
    else:
        in_index = lambda b, f: (b, 0, 0, 0, 0)

    kernel = functools.partial(
        _maxpool3d_kernel, ksize=ksize, stride=stride, odims=(Fo, Ho, Wo),
        frame_blocked=frame_blocked)
    return pl.pallas_call(
        kernel,
        out_shape=jax.ShapeDtypeStruct((B, Fo, Ho, Wo, C), jnp.float32),
        grid=(B, Fo),
        in_specs=[pl.BlockSpec((None, fblk, Hp, Wp, C), in_index)],
        out_specs=pl.BlockSpec((None, None, Ho, Wo, C),
                               lambda b, f: (b, f, 0, 0, 0)),
        compiler_params=pltpu.CompilerParams(
            dimension_semantics=("parallel", "parallel")),
    )(xp)


class VideoTokenizer:
    """JAX/Pallas port of the PyTorch VideoTokenizer (activation=None)."""

    def __init__(self, frame_kernel_size, kernel_size, stride, padding,
                 frame_stride=1, frame_pooling_stride=1,
                 frame_pooling_kernel_size=1, pooling_kernel_size=3,
                 pooling_stride=2, pooling_padding=1, n_conv_layers=1,
                 n_input_channels=3, n_output_channels=64, in_planes=64,
                 max_pool=True, key=jax.random.PRNGKey(0)):
        # `stride`, `padding`, `frame_stride` are unused by the PyTorch conv
        # (it sets conv stride == kernel size); kept for signature fidelity.
        del stride, padding, frame_stride
        self.fk, self.k = frame_kernel_size, kernel_size
        self.max_pool = max_pool
        self.pool_ksize = (frame_pooling_kernel_size, pooling_kernel_size,
                           pooling_kernel_size)
        self.pool_stride = (frame_pooling_stride, pooling_stride, pooling_stride)
        self.pool_pad = (frame_pooling_kernel_size // 2, pooling_padding,
                         pooling_padding)

        n_filter_list = ([n_input_channels]
                         + [in_planes for _ in range(n_conv_layers - 1)]
                         + [n_output_channels])
        self.layers = []
        for cin, cout in zip(n_filter_list[:-1], n_filter_list[1:]):
            key, kw_, kb_ = jax.random.split(key, 3)
            fan_in = cin * self.fk * self.k * self.k
            # kaiming_normal_ (fan_in, gain=sqrt(2)) for the weight.
            w = jax.random.normal(
                kw_, (cout, cin, self.fk, self.k, self.k), jnp.float32
            ) * jnp.sqrt(2.0 / fan_in)
            # PyTorch Conv3d default bias init: U(-1/sqrt(fan_in), 1/sqrt(fan_in)).
            bound = 1.0 / jnp.sqrt(fan_in)
            b = jax.random.uniform(kb_, (cout,), jnp.float32, -bound, bound)
            self.layers.append((w, b))

    def __call__(self, x):
        """x: (B, C, F, H, W) NCDHW -> (B, F'*H'*W', C_out)."""
        x = jnp.transpose(x.astype(jnp.bfloat16), (0, 2, 3, 4, 1))  # -> BFHWC
        for w, b in self.layers:
            cout = w.shape[0]
            x = _patch_conv(x, w, b)            # conv (Pallas tiled matmul)
            if self.max_pool:                   # MaxPool3d (Pallas, tap-based)
                x = _maxpool3d(x, self.pool_ksize, self.pool_stride,
                               self.pool_pad)
            x = x[..., :cout]                   # drop channel padding
        B, F, H, W, C = x.shape
        return x.reshape(B, F * H * W, C)       # 'b c f h w -> b (f h w) c'


# ----------------------------------------------------------------------------
# Reference (plain JAX, full f32) for verification
# ----------------------------------------------------------------------------
def _reference(x, tok):
    x = jnp.transpose(x, (0, 2, 3, 4, 1)).astype(jnp.float32)
    for w, b in tok.layers:
        B, F, H, W, Cin = x.shape
        Cout, _, fk, kh, kw = w.shape
        Fo, Ho, Wo = F // fk, H // kh, W // kw
        xp = x[:, : Fo * fk, : Ho * kh, : Wo * kw, :]
        xp = xp.reshape(B, Fo, fk, Ho, kh, Wo, kw, Cin)
        xp = xp.transpose(0, 1, 3, 5, 7, 2, 4, 6).reshape(B * Fo * Ho * Wo, -1)
        out = xp @ w.reshape(Cout, -1).T + b[None, :]
        x = out.reshape(B, Fo, Ho, Wo, Cout)
        if tok.max_pool:
            kf, khp, kwp = tok.pool_ksize
            sf, sh, sw = tok.pool_stride
            pf, ph, pw = tok.pool_pad
            x = lax.reduce_window(
                x, -jnp.inf, lax.max,
                window_dimensions=(1, kf, khp, kwp, 1),
                window_strides=(1, sf, sh, sw, 1),
                padding=[(0, 0), (pf, pf), (ph, ph), (pw, pw), (0, 0)],
            )
    B, F, H, W, C = x.shape
    return x.reshape(B, F * H * W, C)


if __name__ == "__main__":
    key = jax.random.PRNGKey(0)
    k_x, k_p = jax.random.split(key)

    # Small shapes: B=2, Cin=3, frames=4, H=W=16; conv kernel (2,4,4), Cout=32.
    B, Cin, F, H, W = 2, 3, 4, 16, 16
    x = jax.random.normal(k_x, (B, Cin, F, H, W), jnp.float32)

    tok = VideoTokenizer(
        frame_kernel_size=2, kernel_size=4, stride=4, padding=0,
        n_conv_layers=1, n_input_channels=Cin, n_output_channels=32,
        key=k_p,
    )

    out = jax.block_until_ready(tok(x))
    ref = jax.block_until_ready(_reference(x, tok))

    assert out.shape == (B, 2 * 2 * 2, 32), out.shape
    # Tolerance accounts for intentional bf16 matmul operands (f32 accumulate).
    assert jnp.allclose(out, ref, rtol=5e-2, atol=5e-2), (
        float(jnp.max(jnp.abs(out - ref))))

    print("KERNEL_OK")
</pallas_src>

<mosaic_0001>
module attributes {stable_mosaic.version = 11 : i64} {
  func.func @_conv_matmul_kernel(%arg0: i32, %arg1: memref<64x128xbf16, #tpu.memory_space<vmem>>, %arg2: memref<128x128xbf16, #tpu.memory_space<vmem>>, %arg3: memref<1x128xf32, #tpu.memory_space<vmem>>, %arg4: memref<64x128xf32, #tpu.memory_space<vmem>>) attributes {dimension_semantics = [#tpu.dimension_semantics<parallel>], iteration_bounds = array<i64: 1>, scalar_prefetch = 0 : i64, scratch_operands = 0 : i64, tpu.core_type = #tpu.core_type<tc>, window_params = [{transform_indices = @transform_0, window_bounds = array<i64: 64, 128>}, {pipeline_mode = #tpu.pipeline_mode<synchronous>, transform_indices = @transform_1, window_bounds = array<i64: 128, 128>}, {pipeline_mode = #tpu.pipeline_mode<synchronous>, transform_indices = @transform_2, window_bounds = array<i64: 1, 128>}, {transform_indices = @transform_3, window_bounds = array<i64: 64, 128>}]} {
    %c0 = arith.constant 0 : index
    %c0_0 = arith.constant 0 : index
    %0 = vector.load %arg1[%c0, %c0_0] : memref<64x128xbf16, #tpu.memory_space<vmem>>, vector<64x128xbf16>
    %c0_1 = arith.constant 0 : index
    %c0_2 = arith.constant 0 : index
    %1 = vector.load %arg2[%c0_1, %c0_2] : memref<128x128xbf16, #tpu.memory_space<vmem>>, vector<128x128xbf16>
    %cst = arith.constant dense<0.000000e+00> : vector<64x128xf32>
    %2 = tpu.matmul %0, %1, %cst {dimension_numbers = #tpu.dot_dimension_numbers<[1], [0], [0], [1], [0, 0, 1, 1], [], []>} : vector<64x128xbf16>, vector<128x128xbf16>, vector<64x128xf32> -> vector<64x128xf32>
    %c0_3 = arith.constant 0 : index
    %c0_4 = arith.constant 0 : index
    %3 = vector.load %arg3[%c0_3, %c0_4] : memref<1x128xf32, #tpu.memory_space<vmem>>, vector<1x128xf32>
    %4 = vector.broadcast %3 : vector<1x128xf32> to vector<64x128xf32>
    %5 = arith.addf %2, %4 : vector<64x128xf32>
    %c0_5 = arith.constant 0 : index
    %c0_6 = arith.constant 0 : index
    %6 = vector.load %arg4[%c0_5, %c0_6] : memref<64x128xf32, #tpu.memory_space<vmem>>, vector<64x128xf32>
    tpu.vector_store %arg4[%c0_5, %c0_6], %5 {strides = array<i32>} : memref<64x128xf32, #tpu.memory_space<vmem>>, vector<64x128xf32>,
    return
  }
  func.func @transform_0(%arg0: i32) -> (i32, i32) {
    %c0_i32 = arith.constant 0 : i32
    %c0_i32_0 = arith.constant 0 : i32
    return %arg0, %c0_i32 : i32, i32
  }
  func.func @transform_1(%arg0: i32) -> (i32, i32) {
    %c0_i32 = arith.constant 0 : i32
    %c0_i32_0 = arith.constant 0 : i32
    %c0_i32_1 = arith.constant 0 : i32
    return %c0_i32, %c0_i32_0 : i32, i32
  }
  func.func @transform_2(%arg0: i32) -> (i32, i32) {
    %c0_i32 = arith.constant 0 : i32
    %c0_i32_0 = arith.constant 0 : i32
    %c0_i32_1 = arith.constant 0 : i32
    return %c0_i32, %c0_i32_0 : i32, i32
  }
  func.func @transform_3(%arg0: i32) -> (i32, i32) {
    %c0_i32 = arith.constant 0 : i32
    %c0_i32_0 = arith.constant 0 : i32
    return %arg0, %c0_i32 : i32, i32
  }
}

</mosaic_0001>

<bundles_post_ra>
// kernel: tpu_custom_call.1
= control target key start
LH: loop header
LB: loop body
LE: loop exit
PB: predicated region body
PF: predicated region fallthrough
CT: control target
= control target key end

     0   :  { %8 = vsyncpa [#allocation3], 0  ;;  %s413_s0 = inlined_call_operand.hbm [shape: bf16[64,128], index: 0, kind: input, shape index: {}]   ;;  %s414_s1 = inlined_call_operand.hbm [shape: bf16[128,128], index: 1, kind: input, shape index: {}]   ;;  %s415_s2 = inlined_call_operand.vmem [shape: f32[1,128], index: 2, kind: input, shape index: {}]   ;;  %s416_s3 = inlined_call_operand.hbm [shape: f32[64,128], index: 3, kind: output, shape index: {}]  }
   0x1   :  { %9 = vsyncpa [#allocation6], 0 }
   0x2   :  { %10 = vsyncpa [#allocation4], 0  ;;  %s15_s14 = sshll.u32 %s413_s0, 4  ;;  %s374_s15 = smov [#allocation2]   ;;  %s16_s14 = int_to_ptr.hbm [resolvable:$true] %s15_s14 }
   0x3   :  { %s17_s16 = sshll.u32 %s374_s15, 4  ;;  %s28_s19 = sshll.u32 %s414_s1, 4  ;;  %s18_s16 = int_to_ptr.vmem [resolvable:$true] %s17_s16  ;;  %s29_s19 = int_to_ptr.hbm [resolvable:$true] %s28_s19 }
   0x4   :  { %s375_s20 = smov 64   ;;  %s376_s21 = smov 4  }
   0x5   :  { %23 = dma.hbm_to_vmem [thread:$0]  %s16_s14, 512, %s18_s16, [#allocation3], %s375_s20, %s375_s20, %s376_s21  }
   0x6   :  { %s377_s22 = smov [#allocation5]  }
   0x7   :  { %s30_s23 = sshll.u32 %s377_s22, 4  ;;  %s31_s23 = int_to_ptr.vmem [resolvable:$true] %s30_s23 }
   0x8   :  { %36 = dma.hbm_to_vmem [thread:$0]  %s29_s19, 1024, %s31_s23, [#allocation6], %s375_s20, %s375_s20, %s376_s21  }
   0x9   :  { %368 = dma.done.wait [#allocation3], 512  }
   0xa   :  { %369 = vsyncadd [#allocation3], 4294966784 }
   0xb   :  { %370 = dma.done.wait [#allocation6], 1024  }
   0xc   :  { %371 = vsyncadd [#allocation6], 4294966272  ;;  %v263_v0 = vld [vmem:[#allocation5 + $0x38] sm:$0xff]  ;;  %v262_v1 = vld [vmem:[#allocation5 + $0x30] sm:$0xff]  ;;  %s378_s24 = smov [#allocation7]   ;;  %s190_s27 = sshll.u32 %s416_s3, 4  ;;  %s191_s27 = int_to_ptr.hbm [resolvable:$true] %s190_s27 }
   0xd   :  { %147 = vmatpush.bf16.msra.mxu0 %v263_v0  ;;  %264 = vmatpush.bf16.msra.mxu1 %v263_v0  ;;  %v261_v2 = vld [vmem:[#allocation5 + $0x28] sm:$0xff]  ;;  %v260_v3 = vld [vmem:[#allocation5 + $0x20] sm:$0xff]  ;;  %v259_v4 = vld [vmem:[#allocation5 + $0x18] sm:$0xff]  ;;  %s379_s28 = smov 128   ;;  %s380_s29 = smov 8  }
   0xe   :  { %265 = vmatpush.bf16.msra.mxu2 %v263_v0  ;;  %266 = vmatpush.bf16.msra.mxu3 %v263_v0  ;;  %v258_v5 = vld [vmem:[#allocation5 + $0x10] sm:$0xff]  ;;  %v257_v6 = vld [vmem:[#allocation5 + $0x8] sm:$0xff]  ;;  %v256_v7 = vld [vmem:[#allocation5] sm:$0xff] }
   0xf   :  { %v252_v8 = vld [vmem:[#allocation2] sm:$0xff]  ;;  %v253_v9 = vld [vmem:[#allocation2 + $0x8] sm:$0xff]  ;;  %v254_v10 = vld [vmem:[#allocation2 + $0x10] sm:$0xff] }
  0x10   :  { %v255_v11 = vld [vmem:[#allocation2 + $0x18] sm:$0xff]  ;;  %v295_v12 = vld [vmem:[%s415_s2] ss:$0 sm:$0xff]  ;;  %s188_s2 = sshll.u32 %s378_s24, 4  ;;  %s189_s2 = int_to_ptr.vmem [resolvable:$true] %s188_s2 }
  0x11   :  { %148 = vmatpush.bf16.msra.mxu0 %v262_v1  ;;  %267 = vmatpush.bf16.msra.mxu1 %v262_v1 }
  0x12   :  { %268 = vmatpush.bf16.msra.mxu2 %v262_v1  ;;  %269 = vmatpush.bf16.msra.mxu3 %v262_v1 }
  0x15   :  { %149 = vmatpush.bf16.msra.mxu0 %v261_v2  ;;  %270 = vmatpush.bf16.msra.mxu1 %v261_v2 }
  0x16   :  { %271 = vmatpush.bf16.msra.mxu2 %v261_v2  ;;  %272 = vmatpush.bf16.msra.mxu3 %v261_v2 }
  0x19   :  { %150 = vmatpush.bf16.msra.mxu0 %v260_v3  ;;  %273 = vmatpush.bf16.msra.mxu1 %v260_v3 }
  0x1a   :  { %274 = vmatpush.bf16.msra.mxu2 %v260_v3  ;;  %275 = vmatpush.bf16.msra.mxu3 %v260_v3 }
  0x1d   :  { %151 = vmatpush.bf16.msra.mxu0 %v259_v4  ;;  %276 = vmatpush.bf16.msra.mxu1 %v259_v4 }
  0x1e   :  { %277 = vmatpush.bf16.msra.mxu2 %v259_v4  ;;  %278 = vmatpush.bf16.msra.mxu3 %v259_v4 }
  0x21   :  { %152 = vmatpush.bf16.msra.mxu0 %v258_v5  ;;  %279 = vmatpush.bf16.msra.mxu1 %v258_v5 }
  0x22   :  { %280 = vmatpush.bf16.msra.mxu2 %v258_v5  ;;  %281 = vmatpush.bf16.msra.mxu3 %v258_v5 }
  0x25   :  { %153 = vmatpush.bf16.msra.mxu0 %v257_v6  ;;  %282 = vmatpush.bf16.msra.mxu1 %v257_v6 }
  0x26   :  { %283 = vmatpush.bf16.msra.mxu2 %v257_v6  ;;  %284 = vmatpush.bf16.msra.mxu3 %v257_v6 }
  0x29   :  { %154 = vmatpush.bf16.msra.mxu0 %v256_v7  ;;  %285 = vmatpush.bf16.msra.mxu1 %v256_v7 }
  0x2a   :  { %286 = vmatpush.bf16.msra.mxu2 %v256_v7  ;;  %287 = vmatpush.bf16.msra.mxu3 %v256_v7 }
  0x2c   :  { %155 = vmatmul.bf16.vlgmr.msra.gmra.mxu0 %v252_v8  ;;  %160 = vmatmul.bf16.vlgmr.msra.gmra.mxu1 %v253_v9 }
  0x2d   :  { %165 = vmatmul.bf16.vlgmr.msra.gmra.mxu2 %v254_v10  ;;  %170 = vmatmul.bf16.vlgmr.msra.gmra.mxu3 %v255_v11 }
  0xa9   :  { %v156_v13 = vpop.f32.mrf.mxu0  ;;  %v161_v14 = vpop.f32.mrf.mxu1 }
  0xaa   :  { %v157_v15 = vadd.f32 %v295_v12, %v156_v13  ;;  %v162_v16 = vadd.f32 %v295_v12, %v161_v14 }
  0xac   :  { %176 = vst [vmem:[#allocation7] sm:$0xff] %v157_v15 }
  0xad   :  { %178 = vst [vmem:[#allocation7 + $0x10] sm:$0xff] %v162_v16 }
  0xb0   :  { %v166_v17 = vpop.f32.mrf.mxu2  ;;  %v171_v18 = vpop.f32.mrf.mxu3 }
  0xb1   :  { %v167_v19 = vadd.f32 %v295_v12, %v166_v17  ;;  %v172_v20 = vadd.f32 %v295_v12, %v171_v18  ;;  %v158_v21 = vpop.f32.mrf.mxu0  ;;  %v163_v22 = vpop.f32.mrf.mxu1 }
  0xb2   :  { %v159_v23 = vadd.f32 %v295_v12, %v158_v21  ;;  %v164_v24 = vadd.f32 %v295_v12, %v163_v22 }
  0xb3   :  { %180 = vst [vmem:[#allocation7 + $0x20] sm:$0xff] %v167_v19 }
  0xb4   :  { %182 = vst [vmem:[#allocation7 + $0x30] sm:$0xff] %v172_v20 }
  0xb5   :  { %177 = vst [vmem:[#allocation7 + $0x8] sm:$0xff] %v159_v23 }
  0xb6   :  { %179 = vst [vmem:[#allocation7 + $0x18] sm:$0xff] %v164_v24 }
  0xb8   :  { %v168_v25 = vpop.f32.mrf.mxu2  ;;  %v173_v26 = vpop.f32.mrf.mxu3 }
  0xb9   :  { %v169_v27 = vadd.f32 %v295_v12, %v168_v25  ;;  %v174_v28 = vadd.f32 %v295_v12, %v173_v26 }
  0xbb   :  { %181 = vst [vmem:[#allocation7 + $0x28] sm:$0xff] %v169_v27 }
  0xbc   :  { %183 = vst [vmem:[#allocation7 + $0x38] sm:$0xff] %v174_v28 }
  0xbd   :  { %196 = dma.vmem_to_hbm [thread:$0]  %s189_s2, 1024, %s191_s27, [#allocation4], %s379_s28, %s379_s28, %s380_s29  }
  0xbe   :  { %372 = dma.done.wait [#allocation4], 1024  }
  0xbf   :  { %373 = vsyncadd [#allocation4], 4294966272 }
  0xc0   :  { %201 = vsyncpa [#allocation3], 1 }
  0xc1   :  { %202 = vsyncpa [#allocation6], 1 }
  0xc2   :  { %203 = vsyncpa [#allocation4], 1 }

</bundles_post_ra>
